<compile_context>
chip_gen: v7x
topology: tpu7x:2x2x1
jax: 0.10.0
libtpu: 0.0.40
codegen_flags: <defaults>
</compile_context>

<pallas_src>
import jax
import jax.numpy as jnp
from jax.experimental import pallas as pl
from jax.experimental.pallas import tpu as pltpu


def _round_up(x, m):
    return ((x + m - 1) // m) * m


def _pick_tile_m(B, D, K_pad, budget_bytes=24 * 1024 * 1024):
    """Largest sublane-aligned batch tile whose double-buffered working set
    (x bf16 tile, resident bf16 W, f32 out tile) fits the VMEM budget."""
    b_aligned = _round_up(max(B, 1), 16)
    for tm in (512, 256, 128, 64, 32, 16):
        if tm > b_aligned:
            continue
        need = 2 * tm * D * 2 + 2 * D * K_pad * 2 + 2 * tm * K_pad * 4
        if need <= budget_bytes:
            return tm
    return 16


def _softmodel_kernel(x_ref, w_ref, b_ref, o_ref):
    # x_ref: [TM, D] bf16, w_ref: [D, Kp] bf16, b_ref: [1, Kp] f32,
    # o_ref: [TM, Kp] f32
    logits = jnp.dot(
        x_ref[...], w_ref[...], preferred_element_type=jnp.float32
    ) + b_ref[...]
    # numerically stable softmax over the class axis (dim=1 of [B, K])
    m = jnp.max(logits, axis=-1, keepdims=True)
    e = jnp.exp(logits - m)
    denom = jnp.sum(e, axis=-1, keepdims=True)
    o_ref[...] = e * pl.reciprocal(denom, approx=True)


def soft_model_forward(x_nchw, w, b):
    """softmax(linear(flatten(x)), dim=1), fused in a single Pallas call."""
    B = x_nchw.shape[0]
    D, K = w.shape

    K_PAD = _round_up(K, 128)            # lane-dense output / full MXU N tile
    TM = _pick_tile_m(B, D, K_PAD)       # sublane-aligned, VMEM-aware
    B_PAD = _round_up(B, TM)

    # bf16 MXU feed, f32 accumulate in-kernel.
    x_flat = x_nchw.reshape(B, D).astype(jnp.bfloat16)
    x_pad = jnp.zeros((B_PAD, D), jnp.bfloat16).at[:B, :].set(x_flat)

    w_pad = jnp.zeros((D, K_PAD), jnp.bfloat16).at[:, :K].set(
        w.astype(jnp.bfloat16)
    )
    # Padded classes get a huge negative bias so exp() == 0 and the softmax
    # over the real K classes is unchanged.
    b_pad = jnp.full((1, K_PAD), -1e30, jnp.float32).at[0, :K].set(
        b.astype(jnp.float32)
    )

    grid = (B_PAD // TM,)
    cost = pl.CostEstimate(
        flops=2 * B_PAD * D * K_PAD,
        transcendentals=B_PAD * K_PAD,
        bytes_accessed=B_PAD * D * 2 + D * K_PAD * 2 + K_PAD * 4
        + B_PAD * K_PAD * 4,
    )

    out = pl.pallas_call(
        _softmodel_kernel,
        out_shape=jax.ShapeDtypeStruct((B_PAD, K_PAD), jnp.float32),
        grid=grid,
        in_specs=[
            pl.BlockSpec((TM, D), lambda i: (i, 0)),       # x: tiled over batch
            pl.BlockSpec((D, K_PAD), lambda i: (0, 0)),    # W: VMEM-resident
            pl.BlockSpec((1, K_PAD), lambda i: (0, 0)),    # b: VMEM-resident
        ],
        out_specs=pl.BlockSpec((TM, K_PAD), lambda i: (i, 0)),
        compiler_params=pltpu.CompilerParams(
            dimension_semantics=("parallel",),             # shard batch on v7x 2xTC
            vmem_limit_bytes=32 * 1024 * 1024,
        ),
        cost_estimate=cost,
    )(x_pad, w_pad, b_pad)

    # Drop batch padding and lane padding.
    return out[:B, :K]


if __name__ == "__main__":
    # Small shapes consistent with the module's usage:
    # batch=2, channels=4, spatial 16x16 input, 5 output classes.
    B, C, H, W_sp = 2, 4, 16, 16
    K = 5  # num classes (softmax dim=1)
    D = C * H * W_sp

    key = jax.random.PRNGKey(0)
    kx, kw, kb = jax.random.split(key, 3)
    x = jax.random.normal(kx, (B, C, H, W_sp), dtype=jnp.float32)
    # deterministic synthetic weights for the inner model's linear head
    w = jax.random.normal(kw, (D, K), dtype=jnp.float32) * 0.05
    b = jax.random.normal(kb, (K,), dtype=jnp.float32) * 0.1

    out = jax.block_until_ready(soft_model_forward(x, w, b))

    # Reference: same bf16-cast matmul feed (f32 accumulate) + exact softmax.
    xb = x.reshape(B, D).astype(jnp.bfloat16).astype(jnp.float32)
    wb = w.astype(jnp.bfloat16).astype(jnp.float32)
    ref = jax.nn.softmax(xb @ wb + b, axis=1)

    assert out.shape == (B, K)
    assert jnp.allclose(out, ref, atol=2e-3), "mismatch vs reference"
    assert jnp.allclose(jnp.sum(out, axis=1), 1.0, atol=5e-3)

    print("KERNEL_OK")
</pallas_src>

<mosaic_0001>
module attributes {stable_mosaic.version = 11 : i64} {
  func.func @_softmodel_kernel(%arg0: i32, %arg1: memref<16x1024xbf16, #tpu.memory_space<vmem>>, %arg2: memref<1024x128xbf16, #tpu.memory_space<vmem>>, %arg3: memref<1x128xf32, #tpu.memory_space<vmem>>, %arg4: memref<16x128xf32, #tpu.memory_space<vmem>>) attributes {dimension_semantics = [#tpu.dimension_semantics<parallel>], iteration_bounds = array<i64: 1>, scalar_prefetch = 0 : i64, scratch_operands = 0 : i64, tpu.core_type = #tpu.core_type<tc>, window_params = [{transform_indices = @transform_0, window_bounds = array<i64: 16, 1024>}, {pipeline_mode = #tpu.pipeline_mode<synchronous>, transform_indices = @transform_1, window_bounds = array<i64: 1024, 128>}, {pipeline_mode = #tpu.pipeline_mode<synchronous>, transform_indices = @transform_2, window_bounds = array<i64: 1, 128>}, {transform_indices = @transform_3, window_bounds = array<i64: 16, 128>}]} {
    %c0 = arith.constant 0 : index
    %c0_0 = arith.constant 0 : index
    %0 = vector.load %arg1[%c0, %c0_0] : memref<16x1024xbf16, #tpu.memory_space<vmem>>, vector<16x1024xbf16>
    %c0_1 = arith.constant 0 : index
    %c0_2 = arith.constant 0 : index
    %1 = vector.load %arg2[%c0_1, %c0_2] : memref<1024x128xbf16, #tpu.memory_space<vmem>>, vector<1024x128xbf16>
    %cst = arith.constant dense<0.000000e+00> : vector<16x128xf32>
    %2 = tpu.matmul %0, %1, %cst {dimension_numbers = #tpu.dot_dimension_numbers<[1], [0], [0], [1], [0, 0, 1, 1], [], []>} : vector<16x1024xbf16>, vector<1024x128xbf16>, vector<16x128xf32> -> vector<16x128xf32>
    %c0_3 = arith.constant 0 : index
    %c0_4 = arith.constant 0 : index
    %3 = vector.load %arg3[%c0_3, %c0_4] : memref<1x128xf32, #tpu.memory_space<vmem>>, vector<1x128xf32>
    %4 = vector.broadcast %3 : vector<1x128xf32> to vector<16x128xf32>
    %5 = arith.addf %2, %4 : vector<16x128xf32>
    %cst_5 = arith.constant dense<0xFF800000> : vector<16xf32>
    %6 = vector.multi_reduction <maximumf>, %5, %cst_5 [1] : vector<16x128xf32> to vector<16xf32>
    %7 = vector.shape_cast %6 : vector<16xf32> to vector<16x1xf32>
    %8 = vector.broadcast %7 : vector<16x1xf32> to vector<16x128xf32>
    %9 = arith.subf %5, %8 : vector<16x128xf32>
    %10 = math.exp %9 : vector<16x128xf32>
    %cst_6 = arith.constant dense<0.000000e+00> : vector<16xf32>
    %11 = vector.multi_reduction <add>, %10, %cst_6 [1] : vector<16x128xf32> to vector<16xf32>
    %12 = vector.shape_cast %11 : vector<16xf32> to vector<16x1xf32>
    %13 = tpu.reciprocal %12 {approx = true} : vector<16x1xf32> -> vector<16x1xf32>
    %14 = vector.broadcast %13 : vector<16x1xf32> to vector<16x128xf32>
    %15 = arith.mulf %10, %14 : vector<16x128xf32>
    %c0_7 = arith.constant 0 : index
    %c0_8 = arith.constant 0 : index
    %16 = vector.load %arg4[%c0_7, %c0_8] : memref<16x128xf32, #tpu.memory_space<vmem>>, vector<16x128xf32>
    tpu.vector_store %arg4[%c0_7, %c0_8], %15 {strides = array<i32>} : memref<16x128xf32, #tpu.memory_space<vmem>>, vector<16x128xf32>,
    return
  }
  func.func @transform_0(%arg0: i32) -> (i32, i32) {
    %c0_i32 = arith.constant 0 : i32
    %c0_i32_0 = arith.constant 0 : i32
    return %arg0, %c0_i32 : i32, i32
  }
  func.func @transform_1(%arg0: i32) -> (i32, i32) {
    %c0_i32 = arith.constant 0 : i32
    %c0_i32_0 = arith.constant 0 : i32
    %c0_i32_1 = arith.constant 0 : i32
    return %c0_i32, %c0_i32_0 : i32, i32
  }
  func.func @transform_2(%arg0: i32) -> (i32, i32) {
    %c0_i32 = arith.constant 0 : i32
    %c0_i32_0 = arith.constant 0 : i32
    %c0_i32_1 = arith.constant 0 : i32
    return %c0_i32, %c0_i32_0 : i32, i32
  }
  func.func @transform_3(%arg0: i32) -> (i32, i32) {
    %c0_i32 = arith.constant 0 : i32
    %c0_i32_0 = arith.constant 0 : i32
    return %arg0, %c0_i32 : i32, i32
  }
}

</mosaic_0001>

<bundles_post_ra>
// kernel: tpu_custom_call.1
= control target key start
LH: loop header
LB: loop body
LE: loop exit
PB: predicated region body
PF: predicated region fallthrough
CT: control target
= control target key end

     0   :  { %8 = vsyncpa [#allocation3], 0  ;;  %s1195_s0 = inlined_call_operand.hbm [shape: bf16[16,1024], index: 0, kind: input, shape index: {}]   ;;  %s1196_s1 = inlined_call_operand.hbm [shape: bf16[1024,128], index: 1, kind: input, shape index: {}]   ;;  %s1197_s2 = inlined_call_operand.vmem [shape: f32[1,128], index: 2, kind: input, shape index: {}]   ;;  %s1198_s3 = inlined_call_operand.hbm [shape: f32[16,128], index: 3, kind: output, shape index: {}]  }
   0x1   :  { %9 = vsyncpa [#allocation6], 0 }
   0x2   :  { %10 = vsyncpa [#allocation4], 0  ;;  %s1127_s12 = smov [#allocation2]   ;;  %s1055_s16 = scalar_lea.hbm %s1195_s0, 1024 }
   0x3   :  { %s16_s13 = sshll.u32 %s1127_s12, 4  ;;  %p1056_p0 = scmp.ne.s32.totalorder %s1195_s0, %s1055_s16  ;;  %s17_s13 = int_to_ptr.vmem [resolvable:$true] %s16_s13 }
   0x4   :  { %p1059_p1 = scmp.lt.u32.totalorder %s1055_s16, %s1195_s0 }
   0x6   :  { %p1061_p2 = pnand %p1059_p1, %p1056_p0 }
   0x8   :  { %1064 = shalt.err (!%p1061_p2)
}
   0x9   :  { %s1065_s21 = scalar_lea.vmem %s17_s13, 1024  ;;  %p1070_p4 = scmp.lt.s32.totalorder %s17_s13, %s17_s13 }
   0xa   :  { %p1066_p3 = scmp.ne.s32.totalorder %s17_s13, %s1065_s21  ;;  %p1071_p5 = scmp.lt.s32.totalorder %s1065_s21, %s1065_s21 }
   0xc   :  { %p1072_p6 = por %p1071_p5, %p1070_p4 }
   0xe   :  { %p1073_p7 = pnand %p1072_p6, %p1066_p3 }
  0x10   :  { %1076 = shalt.err (!%p1073_p7)
}
  0x11   :  { %s1128_s22 = smov 512   ;;  %s1129_s23 = smov 32  }
  0x12   :  { %22 = dma.hbm_to_vmem [thread:$0]  %s1195_s0, 1024, %s17_s13, [#allocation3], %s1128_s22, %s1128_s22, %s1129_s23  }
  0x13   :  { %s1130_s26 = smov [#allocation5]   ;;  %s1077_s30 = scalar_lea.hbm %s1196_s1, 8192 }
  0x14   :  { %s28_s27 = sshll.u32 %s1130_s26, 4  ;;  %p1078_p8 = scmp.ne.s32.totalorder %s1196_s1, %s1077_s30  ;;  %s29_s27 = int_to_ptr.vmem [resolvable:$true] %s28_s27 }
  0x15   :  { %p1081_p9 = scmp.lt.u32.totalorder %s1077_s30, %s1196_s1 }
  0x17   :  { %p1083_p10 = pnand %p1081_p9, %p1078_p8 }
  0x19   :  { %1086 = shalt.err (!%p1083_p10)
}
  0x1a   :  { %s1087_s8 = scalar_lea.vmem %s29_s27, 8192  ;;  %p1092_p12 = scmp.lt.s32.totalorder %s29_s27, %s29_s27 }
  0x1b   :  { %p1088_p11 = scmp.ne.s32.totalorder %s29_s27, %s1087_s8  ;;  %p1093_p13 = scmp.lt.s32.totalorder %s1087_s8, %s1087_s8 }
  0x1d   :  { %p1094_p0 = por %p1093_p13, %p1092_p12 }
  0x1f   :  { %p1095_p1 = pnand %p1094_p0, %p1088_p11 }
  0x21   :  { %1098 = shalt.err (!%p1095_p1)
}
  0x22   :  { %s1131_s0 = smov 64   ;;  %s1132_s9 = smov 4  }
  0x23   :  { %34 = dma.hbm_to_vmem [thread:$0]  %s1196_s1, 8192, %s29_s27, [#allocation6], %s1131_s0, %s1131_s0, %s1132_s9  }
  0x24   :  { %1121 = dma.done.wait [#allocation3], 1024  }
  0x25   :  { %1122 = vsyncadd [#allocation3], 4294966272 }
  0x26   :  { %1123 = dma.done.wait [#allocation6], 8192  }
  0x27   :  { %1124 = vsyncadd [#allocation6], 4294959104  ;;  %v983_v0 = vld [vmem:[#allocation5 + $0x40] sm:$0xff]   ;;  %v987_v4 = vld [vmem:[#allocation5 + $0x48] sm:$0xff]  }
  0x28   :  { %v984_v1 = vld [vmem:[#allocation5 + $0xc0] sm:$0xff]   ;;  %886 = vmatprep.subr.bf16.mxu0 %v983_v0  ;;  %v988_v5 = vld [vmem:[#allocation5 + $0xc8] sm:$0xff]   ;;  %v991_v8 = vld [vmem:[#allocation5 + $0x50] sm:$0xff]  }
  0x29   :  { %v985_v2 = vld [vmem:[#allocation5] sm:$0xff]   ;;  %908 = vmatprep.subr.bf16.mxu1 %v984_v1  ;;  %v989_v6 = vld [vmem:[#allocation5 + $0x8] sm:$0xff]   ;;  %v992_v9 = vld [vmem:[#allocation5 + $0xd0] sm:$0xff]  }
  0x2a   :  { %v986_v3 = vld [vmem:[#allocation5 + $0x80] sm:$0xff]   ;;  %887 = vmatpush3.bf16.msra.mxu0 %v985_v2  ;;  %v990_v7 = vld [vmem:[#allocation5 + $0x88] sm:$0xff]   ;;  %v993_v10 = vld [vmem:[#allocation5 + $0x10] sm:$0xff]  }
  0x2b   :  { %909 = vmatpush3.bf16.msra.mxu1 %v986_v3  ;;  %888 = vmatprep.subr.bf16.mxu0 %v987_v4  ;;  %v994_v11 = vld [vmem:[#allocation5 + $0x90] sm:$0xff]   ;;  %v995_v12 = vld [vmem:[#allocation5 + $0x58] sm:$0xff]   ;;  %v999_v16 = vld [vmem:[#allocation5 + $0x60] sm:$0xff]  }
  0x2c   :  { %910 = vmatprep.subr.bf16.mxu1 %v988_v5  ;;  %v996_v13 = vld [vmem:[#allocation5 + $0xd8] sm:$0xff]   ;;  %v1000_v17 = vld [vmem:[#allocation5 + $0xe0] sm:$0xff]   ;;  %v1003_v20 = vld [vmem:[#allocation5 + $0x68] sm:$0xff]  }
  0x2d   :  { %v997_v14 = vld [vmem:[#allocation5 + $0x18] sm:$0xff]   ;;  %v1001_v18 = vld [vmem:[#allocation5 + $0x20] sm:$0xff]   ;;  %v1004_v21 = vld [vmem:[#allocation5 + $0xe8] sm:$0xff]  }
  0x2e   :  { %889 = vmatpush3.bf16.msra.mxu0 %v989_v6  ;;  %v998_v15 = vld [vmem:[#allocation5 + $0x98] sm:$0xff]   ;;  %v1002_v19 = vld [vmem:[#allocation5 + $0xa0] sm:$0xff]   ;;  %v1005_v22 = vld [vmem:[#allocation5 + $0x28] sm:$0xff]  }
  0x2f   :  { %911 = vmatpush3.bf16.msra.mxu1 %v990_v7  ;;  %890 = vmatprep.subr.bf16.mxu0 %v991_v8  ;;  %v1006_v23 = vld [vmem:[#allocation5 + $0xa8] sm:$0xff]   ;;  %v1007_v24 = vld [vmem:[#allocation5 + $0x70] sm:$0xff]   ;;  %v1011_v28 = vld [vmem:[#allocation5 + $0x78] sm:$0xff]  }
  0x30   :  { %912 = vmatprep.subr.bf16.mxu1 %v992_v9  ;;  %v1008_v25 = vld [vmem:[#allocation5 + $0xf0] sm:$0xff]   ;;  %v1012_v29 = vld [vmem:[#allocation5 + $0xf8] sm:$0xff]   ;;  %v44_v32 = vld [vmem:[#allocation2] sm:$0xff] }
  0x31   :  { %v1009_v26 = vld [vmem:[#allocation5 + $0x30] sm:$0xff]   ;;  %v1013_v30 = vld [vmem:[#allocation5 + $0x38] sm:$0xff]   ;;  %v48_v33 = vld [vmem:[#allocation2 + $0x20] sm:$0xff] }
  0x32   :  { %891 = vmatpush3.bf16.msra.mxu0 %v993_v10  ;;  %v1010_v27 = vld [vmem:[#allocation5 + $0xb0] sm:$0xff]   ;;  %v1014_v31 = vld [vmem:[#allocation5 + $0xb8] sm:$0xff]   ;;  %v45_v34 = vld [vmem:[#allocation2 + $0x8] sm:$0xff]  ;;  %v814_v35 = vcombine.low %v44_v32, %v48_v33  ;;  %v815_v36 = vcombine.high %v44_v32, %v48_v33 }
  0x33   :  { %913 = vmatpush3.bf16.msra.mxu1 %v994_v11  ;;  %892 = vmatprep.subr.bf16.mxu0 %v995_v12  ;;  %v49_v37 = vld [vmem:[#allocation2 + $0x28] sm:$0xff]  ;;  %v1015_v40 = vld [vmem:[#allocation5 + $0x140] sm:$0xff]   ;;  %v1023_v48 = vld [vmem:[#allocation5 + $0x150] sm:$0xff]  }
  0x34   :  { %914 = vmatprep.subr.bf16.mxu1 %v996_v13  ;;  %v816_v38 = vcombine.low %v45_v34, %v49_v37  ;;  %v817_v39 = vcombine.high %v45_v34, %v49_v37  ;;  %643 = vmatprep.mubr.bf16.mxu0 %v815_v36  ;;  %v1016_v41 = vld [vmem:[#allocation5 + $0x1c0] sm:$0xff]   ;;  %v1019_v44 = vld [vmem:[#allocation5 + $0x148] sm:$0xff]   ;;  %v1024_v49 = vld [vmem:[#allocation5 + $0x1d0] sm:$0xff]  }
  0x35   :  { %v1017_v42 = vld [vmem:[#allocation5 + $0x100] sm:$0xff]   ;;  %v1020_v45 = vld [vmem:[#allocation5 + $0x1c8] sm:$0xff]   ;;  %v1025_v50 = vld [vmem:[#allocation5 + $0x110] sm:$0xff]  }
  0x36   :  { %893 = vmatpush3.bf16.msra.mxu0 %v997_v14  ;;  %684 = vmatprep.mubr.bf16.mxu1 %v817_v39  ;;  %v1018_v43 = vld [vmem:[#allocation5 + $0x180] sm:$0xff]   ;;  %v1021_v46 = vld [vmem:[#allocation5 + $0x108] sm:$0xff]   ;;  %v1026_v51 = vld [vmem:[#allocation5 + $0x190] sm:$0xff]  }
  0x37   :  { %915 = vmatpush3.bf16.msra.mxu1 %v998_v15  ;;  %894 = vmatprep.subr.bf16.mxu0 %v999_v16  ;;  %v1022_v47 = vld [vmem:[#allocation5 + $0x188] sm:$0xff]   ;;  %v1027_v52 = vld [vmem:[#allocation5 + $0x158] sm:$0xff]   ;;  %v1031_v56 = vld [vmem:[#allocation5 + $0x160] sm:$0xff]  }
  0x38   :  { %916 = vmatprep.subr.bf16.mxu1 %v1000_v17  ;;  %v1028_v53 = vld [vmem:[#allocation5 + $0x1d8] sm:$0xff]   ;;  %v1032_v57 = vld [vmem:[#allocation5 + $0x1e0] sm:$0xff]   ;;  %v1035_v60 = vld [vmem:[#allocation5 + $0x168] sm:$0xff]  }
  0x39   :  { %v1029_v54 = vld [vmem:[#allocation5 + $0x118] sm:$0xff]   ;;  %v1033_v58 = vld [vmem:[#allocation5 + $0x120] sm:$0xff]   ;;  %v1036_v61 = vld [vmem:[#allocation5 + $0x1e8] sm:$0xff]  }
  0x3a   :  { %895 = vmatpush3.bf16.msra.mxu0 %v1001_v18  ;;  %v1030_v55 = vld [vmem:[#allocation5 + $0x198] sm:$0xff]   ;;  %v1034_v59 = vld [vmem:[#allocation5 + $0x1a0] sm:$0xff]   ;;  %v1037_v62 = vld [vmem:[#allocation5 + $0x128] sm:$0xff]  }
  0x3b   :  { %917 = vmatpush3.bf16.msra.mxu1 %v1002_v19  ;;  %896 = vmatprep.subr.bf16.mxu0 %v1003_v20  ;;  %v1038_v63 = vld [vmem:[#allocation5 + $0x1a8] sm:$0xff]   ;;  %v1039_v0 = vld [vmem:[#allocation5 + $0x170] sm:$0xff]   ;;  %v1043_v4 = vld [vmem:[#allocation5 + $0x178] sm:$0xff]  }
  0x3c   :  { %918 = vmatprep.subr.bf16.mxu1 %v1004_v21  ;;  %v1040_v1 = vld [vmem:[#allocation5 + $0x1f0] sm:$0xff]   ;;  %v1044_v5 = vld [vmem:[#allocation5 + $0x1f8] sm:$0xff]   ;;  %v813_v18 = vld [vmem:[%s1197_s2] ss:$0 sm:$0xff]  ;;  %s1133_s2 = smov [#allocation7]  }
  0x3d   :  { %v1041_v2 = vld [vmem:[#allocation5 + $0x130] sm:$0xff]   ;;  %v1045_v6 = vld [vmem:[#allocation5 + $0x138] sm:$0xff]   ;;  %s800_s13 = sshll.u32 %s1133_s2, 4  ;;  %s801_s13 = int_to_ptr.vmem [resolvable:$true] %s800_s13 }
  0x3e   :  { %897 = vmatpush3.bf16.msra.mxu0 %v1005_v22  ;;  %v1042_v3 = vld [vmem:[#allocation5 + $0x1b0] sm:$0xff]   ;;  %v1046_v7 = vld [vmem:[#allocation5 + $0x1b8] sm:$0xff]   ;;  %s1099_s14 = scalar_lea.vmem %s801_s13, 256  ;;  %p1104_p3 = scmp.lt.s32.totalorder %s801_s13, %s801_s13 }
  0x3f   :  { %919 = vmatpush3.bf16.msra.mxu1 %v1006_v23  ;;  %898 = vmatprep.subr.bf16.mxu0 %v1007_v24  ;;  %v46_v8 = vld [vmem:[#allocation2 + $0x10] sm:$0xff]  ;;  %v47_v12 = vld [vmem:[#allocation2 + $0x18] sm:$0xff]  ;;  %p1100_p2 = scmp.ne.s32.totalorder %s801_s13, %s1099_s14  ;;  %p1105_p4 = scmp.lt.s32.totalorder %s1099_s14, %s1099_s14 }
  0x40   :  { %920 = vmatprep.subr.bf16.mxu1 %v1008_v25  ;;  %v50_v9 = vld [vmem:[#allocation2 + $0x30] sm:$0xff]  ;;  %v51_v13 = vld [vmem:[#allocation2 + $0x38] sm:$0xff] }
  0x41   :  { %v818_v10 = vcombine.low %v46_v8, %v50_v9  ;;  %v819_v11 = vcombine.high %v46_v8, %v50_v9  ;;  %v820_v14 = vcombine.low %v47_v12, %v51_v13  ;;  %v821_v15 = vcombine.high %v47_v12, %v51_v13  ;;  %p1106_p5 = por %p1105_p4, %p1104_p3 }
  0x42   :  { %899 = vmatpush3.bf16.msra.mxu0 %v1009_v26 }
  0x43   :  { %921 = vmatpush3.bf16.msra.mxu1 %v1010_v27  ;;  %900 = vmatprep.subr.bf16.mxu0 %v1011_v28  ;;  %p1107_p6 = pnand %p1106_p5, %p1100_p2 }
  0x44   :  { %922 = vmatprep.subr.bf16.mxu1 %v1012_v29 }
  0x46   :  { %901 = vmatpush3.bf16.msra.mxu0 %v1013_v30 }
  0x47   :  { %923 = vmatpush3.bf16.msra.mxu1 %v1014_v31  ;;  %930 = vmatprep.subr.bf16.mxu0 %v1015_v40 }
  0x48   :  { %952 = vmatprep.subr.bf16.mxu1 %v1016_v41 }
  0x49   :  { %644 = vmatmul.mubr.bf16.vlgmr.msra.gmra.mrb[0].mxu0 %v814_v35 }
  0x4a   :  { %685 = vmatmul.mubr.bf16.vlgmr.msra.gmra.mrb[0].mxu1 %v816_v38  ;;  %931 = vmatpush3.bf16.msra.mxu0 %v1017_v42 }
  0x4b   :  { %953 = vmatpush3.bf16.msra.mxu1 %v1018_v43  ;;  %932 = vmatprep.subr.bf16.mxu0 %v1019_v44 }
  0x4c   :  { %954 = vmatprep.subr.bf16.mxu1 %v1020_v45  ;;  %725 = vmatprep.mubr.bf16.mxu0 %v819_v11 }
  0x4d   :  { %766 = vmatprep.mubr.bf16.mxu1 %v821_v15 }
  0x4e   :  { %933 = vmatpush3.bf16.msra.mxu0 %v1021_v46 }
  0x4f   :  { %955 = vmatpush3.bf16.msra.mxu1 %v1022_v47  ;;  %934 = vmatprep.subr.bf16.mxu0 %v1023_v48 }
  0x50   :  { %956 = vmatprep.subr.bf16.mxu1 %v1024_v49 }
  0x52   :  { %935 = vmatpush3.bf16.msra.mxu0 %v1025_v50 }
  0x53   :  { %957 = vmatpush3.bf16.msra.mxu1 %v1026_v51  ;;  %936 = vmatprep.subr.bf16.mxu0 %v1027_v52 }
  0x54   :  { %958 = vmatprep.subr.bf16.mxu1 %v1028_v53 }
  0x56   :  { %937 = vmatpush3.bf16.msra.mxu0 %v1029_v54 }
  0x57   :  { %959 = vmatpush3.bf16.msra.mxu1 %v1030_v55  ;;  %938 = vmatprep.subr.bf16.mxu0 %v1031_v56 }
  0x58   :  { %960 = vmatprep.subr.bf16.mxu1 %v1032_v57 }
  0x5a   :  { %939 = vmatpush3.bf16.msra.mxu0 %v1033_v58 }
  0x5b   :  { %961 = vmatpush3.bf16.msra.mxu1 %v1034_v59  ;;  %940 = vmatprep.subr.bf16.mxu0 %v1035_v60 }
  0x5c   :  { %962 = vmatprep.subr.bf16.mxu1 %v1036_v61 }
  0x5e   :  { %941 = vmatpush3.bf16.msra.mxu0 %v1037_v62 }
  0x5f   :  { %963 = vmatpush3.bf16.msra.mxu1 %v1038_v63  ;;  %942 = vmatprep.subr.bf16.mxu0 %v1039_v0 }
  0x60   :  { %964 = vmatprep.subr.bf16.mxu1 %v1040_v1 }
  0x62   :  { %943 = vmatpush3.bf16.msra.mxu0 %v1041_v2 }
  0x63   :  { %965 = vmatpush3.bf16.msra.mxu1 %v1042_v3  ;;  %944 = vmatprep.subr.bf16.mxu0 %v1043_v4 }
  0x64   :  { %966 = vmatprep.subr.bf16.mxu1 %v1044_v5 }
  0x66   :  { %945 = vmatpush3.bf16.msra.mxu0 %v1045_v6 }
  0x67   :  { %967 = vmatpush3.bf16.msra.mxu1 %v1046_v7 }
  0x69   :  { %726 = vmatmul.mubr.bf16.vlgmr.msra.gmra.mrb[4].mxu0 %v818_v10 }
  0x6a   :  { %767 = vmatmul.mubr.bf16.vlgmr.msra.gmra.mrb[4].mxu1 %v820_v14 }
 0x11c   :  { %v902_v16 = vpop.f32.mrb[0].mxu0 }
 0x11d   :  { %v924_v17 = vpop.f32.mrb[0].mxu1  ;;  %v903_v19 = vpop.f32.mrb[1].mxu0 }
 0x11e   :  { %v904_v20 = vadd.f32 %v903_v19, %v902_v16  ;;  %v925_v21 = vpop.f32.mrb[1].mxu1  ;;  %v905_v22 = vpop.f32.mrb[2].mxu0 }
 0x11f   :  { %v926_v23 = vadd.f32 %v925_v21, %v924_v17  ;;  %v927_v24 = vpop.f32.mrb[2].mxu1  ;;  %v906_v25 = vpop.f32.mrb[3].mxu0 }
 0x120   :  { %v646_v26 = vadd.f32 %v904_v20, %v813_v18  ;;  %v907_v27 = vadd.f32 %v906_v25, %v905_v22  ;;  %v928_v28 = vpop.f32.mrb[3].mxu1 }
 0x121   :  { %v929_v29 = vadd.f32 %v928_v28, %v927_v24 }
 0x122   :  { %v687_v30 = vadd.f32 %v926_v23, %v646_v26  ;;  %v649_v31 = vadd.f32 %v907_v27, %v813_v18 }
 0x124   :  { %v690_v32 = vadd.f32 %v929_v29, %v649_v31 }
 0x13c   :  { %v946_v33 = vpop.f32.mrb[4].mxu0 }
 0x13d   :  { %v968_v34 = vpop.f32.mrb[4].mxu1  ;;  %v947_v35 = vpop.f32.mrb[5].mxu0 }
 0x13e   :  { %v948_v36 = vadd.f32 %v947_v35, %v946_v33  ;;  %v969_v37 = vpop.f32.mrb[5].mxu1  ;;  %v949_v38 = vpop.f32.mrb[6].mxu0 }
 0x13f   :  { %v970_v39 = vadd.f32 %v969_v37, %v968_v34  ;;  %v971_v40 = vpop.f32.mrb[6].mxu1  ;;  %v950_v41 = vpop.f32.mrb[7].mxu0 }
 0x140   :  { %v728_v42 = vadd.f32 %v948_v36, %v687_v30  ;;  %v951_v43 = vadd.f32 %v950_v41, %v949_v38  ;;  %v972_v44 = vpop.f32.mrb[7].mxu1 }
 0x141   :  { %v973_v45 = vadd.f32 %v972_v44, %v971_v40 }
 0x142   :  { %v731_v46 = vadd.f32 %v951_v43, %v690_v32  ;;  %v769_v47 = vadd.f32 %v970_v39, %v728_v42 }
 0x144   :  { %775 = vmax.xlane.f32.xlu0 %v769_v47  ;;  %v772_v48 = vadd.f32 %v973_v45, %v731_v46 }
 0x148   :  { %777 = vmax.xlane.f32.xlu0 %v772_v48 }
 0x1d1   :  { %v776_v49 = vpop.xlane.xlu0 %775 }
 0x1d2   :  { %v779_v50 = vsub.f32 %v769_v47, %v776_v49 }
 0x1d4   :  { %v781_v51 = vmul.f32 1.442695, %v779_v50 }
 0x1d5   :  { %v778_v52 = vpop.xlane.xlu0 %777 }
 0x1d6   :  { %1047 = vpow2.f32 %v781_v51  ;;  %v780_v53 = vsub.f32 %v772_v48, %v778_v52 }
 0x1d8   :  { %v783_v54 = vmul.f32 1.442695, %v780_v53 }
 0x1da   :  { %1049 = vpow2.f32 %v783_v54 }
 0x1e0   :  { %v1048_v55 = vpop.eup %1047 }
 0x1e1   :  { %785 = vadd.xlane.f32.xlu1 %v1048_v55 }
 0x1e4   :  { %v1050_v56 = vpop.eup %1049 }
 0x1e5   :  { %787 = vadd.xlane.f32.xlu1 %v1050_v56 }
 0x26e   :  { %v786_v57 = vpop.xlane.xlu1 %785 }
 0x26f   :  { %1051 = vrcp.f32 %v786_v57 }
 0x272   :  { %v788_v58 = vpop.xlane.xlu1 %787 }
 0x273   :  { %1053 = vrcp.f32 %v788_v58 }
 0x279   :  { %v1052_v59 = vpop.eup %1051 }
 0x27a   :  { %v791_v60 = vmul.f32 %v1052_v59, %v1048_v55 }
 0x27c   :  { %793 = vst [vmem:[#allocation7] sm:$0xff] %v791_v60 }
 0x27d   :  { %v1054_v61 = vpop.eup %1053 }
 0x27e   :  { %v792_v62 = vmul.f32 %v1054_v61, %v1050_v56 }
 0x280   :  { %794 = vst [vmem:[#allocation7 + $0x8] sm:$0xff] %v792_v62 }
 0x281   :  { %1110 = shalt.err (!%p1107_p6)
}
 0x282   :  { %s1111_s17 = scalar_lea.hbm %s1198_s3, 256 }
 0x283   :  { %p1112_p7 = scmp.ne.s32.totalorder %s1198_s3, %s1111_s17  ;;  %p1115_p8 = scmp.lt.u32.totalorder %s1111_s17, %s1198_s3 }
 0x285   :  { %p1117_p9 = pnand %p1115_p8, %p1112_p7 }
 0x287   :  { %1120 = shalt.err (!%p1117_p9)
}
 0x288   :  { %s1134_s22 = smov 128   ;;  %s1135_s23 = smov 8  }
 0x289   :  { %806 = dma.vmem_to_hbm [thread:$0]  %s801_s13, 256, %s1198_s3, [#allocation4], %s1134_s22, %s1134_s22, %s1135_s23  }
 0x28a   :  { %1125 = dma.done.wait [#allocation4], 256  }
 0x28b   :  { %1126 = vsyncadd [#allocation4], 4294967040 }
 0x28c   :  { %810 = vsyncpa [#allocation3], 1 }
 0x28d   :  { %811 = vsyncpa [#allocation6], 1 }
 0x28e   :  { %812 = vsyncpa [#allocation4], 1 }

</bundles_post_ra>
